<compile_context>
chip_gen: v7x
topology: tpu7x:2x2x1
jax: 0.10.0
libtpu: 0.0.40
codegen_flags: <defaults>
</compile_context>

<pallas_src>
import jax
import jax.numpy as jnp
from jax import lax
from jax.experimental import pallas as pl
from jax.experimental.pallas import tpu as pltpu


# ----------------------------------------------------------------------------- parameters

def fold_conv2_params(w2, b2):
    """Fold `out = conv2(x) + x` into a single tap-major weight matrix.

    Returns:
      w_cat: (C, 3C) bf16 = [W_k0 | W_k1 + I | W_k2]   (identity == the residual add)
      b_col: (C, 1)  f32  conv2 bias (applied in the f32 epilogue).
    """
    C = w2.shape[0]
    w = w2.astype(jnp.float32)
    w_cat = jnp.concatenate(
        [w[:, :, 0], w[:, :, 1] + jnp.eye(C, dtype=jnp.float32), w[:, :, 2]], axis=1)
    return w_cat.astype(jnp.bfloat16), b2.astype(jnp.float32).reshape(C, 1)


# -------------------------------------------------------------------------------- kernels

def _residual_conv_tiled_kernel(xc_ref, xl_ref, xr_ref, w_ref, b_ref, o_ref):
    """One (batch, L-tile) grid step: o = [W0 | W1+I | W2] @ [x(l-1); x(l); x(l+1)] + b."""
    j = pl.program_id(1)
    nt = pl.num_programs(1)

    xc = xc_ref[0]                                    # (C, TL) bf16, TL % 128 == 0
    c, tl = xc.shape
    hw = xl_ref.shape[2]

    # Halo columns x[:, j*TL - 1] / x[:, (j+1)*TL]; zero at the conv's zero-padding boundary.
    zcol = jnp.zeros((c, 1), xc.dtype)
    left = jnp.where(j > 0, xl_ref[0][:, hw - 1:hw], zcol)
    right = jnp.where(j < nt - 1, xr_ref[0][:, 0:1], zcol)

    # Shifted tap views, built once per tile (roll runs on the XLU, off the mem-bound path).
    lane = lax.broadcasted_iota(jnp.int32, (c, tl), 1)
    x_m1 = jnp.where(lane == 0, left, pltpu.roll(xc, 1, axis=1))             # x[:, l-1]
    x_p1 = jnp.where(lane == tl - 1, right, pltpu.roll(xc, tl - 1, axis=1))  # x[:, l+1]

    # Single fused K=3C matmul on the MXU (bf16 in, f32 accumulate), bias in f32 epilogue.
    xstk = jnp.concatenate([x_m1, xc, x_p1], axis=0)                         # (3C, TL)
    acc = jnp.dot(w_ref[...], xstk, preferred_element_type=jnp.float32)      # (C, TL) f32
    o_ref[0] = (acc + b_ref[...]).astype(o_ref.dtype)


def _residual_conv_single_kernel(x_ref, w_ref, b_ref, o_ref):
    """Small-shape fallback: the whole (C, L) row fits in one block (no halo inputs)."""
    x = x_ref[0]                                      # (C, L) bf16
    c, l = x.shape
    zcol = jnp.zeros((c, 1), x.dtype)
    x_m1 = jnp.concatenate([zcol, x[:, :l - 1]], axis=1)   # x[:, l-1] (zero-padded)
    x_p1 = jnp.concatenate([x[:, 1:], zcol], axis=1)       # x[:, l+1] (zero-padded)
    w = w_ref[...]                                    # (C, 3C) bf16
    acc = jnp.dot(w[:, :c], x_m1, preferred_element_type=jnp.float32)
    acc = acc + jnp.dot(w[:, c:2 * c], x, preferred_element_type=jnp.float32)
    acc = acc + jnp.dot(w[:, 2 * c:], x_p1, preferred_element_type=jnp.float32)
    o_ref[0] = (acc + b_ref[...]).astype(o_ref.dtype)


# -------------------------------------------------------------------------------- wrapper

_VMEM_TILE_BUDGET = 20 * 1024 * 1024   # keep per-step footprint well under 32 MiB scoped VMEM
_BYTES_PER_LANE_COL = 28               # rough per-(C*TL) bytes: 2x dbl-buffered bf16 in,
                                       # 2x f32 out, bf16 tap stack, f32 accumulator.


def _pick_tile_l(L, C, max_tl):
    cap = (_VMEM_TILE_BUDGET // (_BYTES_PER_LANE_COL * max(C, 1))) // 128 * 128
    cap = min(max_tl, cap)
    cap = max(128, (cap // 128) * 128)
    if L <= cap:
        return L                        # single tile per batch row
    for tl in range(cap, 127, -128):    # largest 128-multiple tile that divides L
        if L % tl == 0:
            return tl
    # TODO(synk): ragged L (no 128-multiple divisor <= cap) falls back to one whole-row tile;
    # pad L or add masked edge-tile handling for such production shapes.
    return L


def residual_block(x, w2, b2, *, max_tl=1024):
    """ResidualBlock.forward(x) == conv2(x) + bias2 + x, as a Pallas TPU kernel.

    x:  (N, C, L) float32 (NCW, PyTorch Conv1d layout)
    w2: (C, C, 3) float32 conv2 weight (out_ch, in_ch, k), stride=1, padding=1
    b2: (C,)      float32 conv2 bias
    """
    N, C, L = x.shape
    w_cat, b_col = fold_conv2_params(w2, b2)
    x_lo = x.astype(jnp.bfloat16)        # bf16 feed for the MXU, half the HBM bytes for x

    tl = _pick_tile_l(L, C, max_tl)
    nt = L // tl
    compiler_params = pltpu.CompilerParams(
        dimension_semantics=("parallel",) * (1 if nt == 1 else 2),
        vmem_limit_bytes=32 * 1024 * 1024)
    out_shape = jax.ShapeDtypeStruct((N, C, L), jnp.float32)

    if nt == 1:
        # Whole row per step.  (For the toy shapes below the whole problem is a couple of
        # ~0.35us grid steps, so batch-folding tricks are not worth the layout plumbing;
        # real shapes take the lane-dense tiled path.)
        grid_spec = pltpu.PrefetchScalarGridSpec(
            num_scalar_prefetch=0,
            grid=(N,),
            in_specs=[
                pl.BlockSpec((1, C, L), lambda n: (n, 0, 0)),
                pl.BlockSpec((C, 3 * C), lambda n: (0, 0)),
                pl.BlockSpec((C, 1), lambda n: (0, 0)),
            ],
            out_specs=pl.BlockSpec((1, C, L), lambda n: (n, 0, 0)),
        )
        return pl.pallas_call(
            _residual_conv_single_kernel, out_shape=out_shape, grid_spec=grid_spec,
            compiler_params=compiler_params)(x_lo, w_cat, b_col)

    # L-tiled path: grid (N, L/TL), both axes parallel (gives the v7x megacore two axes).
    # The k=3 halo columns come from two extra 128-wide *pipelined* blocks of the same
    # unpadded x (extra HBM read = 2*128/TL of x, vs. the old pad's full read+write pass).
    # TODO(synk): a manual (C, 1) DMA from an ANY-space ref would shave that remainder too.
    hw = 128
    r = tl // hw
    nbh = L // hw
    grid_spec = pltpu.PrefetchScalarGridSpec(
        num_scalar_prefetch=0,
        grid=(N, nt),
        in_specs=[
            pl.BlockSpec((1, C, tl), lambda n, j: (n, 0, j)),
            pl.BlockSpec((1, C, hw),
                         lambda n, j: (n, 0, jnp.maximum(j * r - 1, 0))),          # left halo
            pl.BlockSpec((1, C, hw),
                         lambda n, j: (n, 0, jnp.minimum((j + 1) * r, nbh - 1))),  # right halo
            pl.BlockSpec((C, 3 * C), lambda n, j: (0, 0)),   # constant index -> stays resident
            pl.BlockSpec((C, 1), lambda n, j: (0, 0)),
        ],
        out_specs=pl.BlockSpec((1, C, tl), lambda n, j: (n, 0, j)),
    )
    return pl.pallas_call(
        _residual_conv_tiled_kernel, out_shape=out_shape, grid_spec=grid_spec,
        compiler_params=compiler_params)(x_lo, x_lo, x_lo, w_cat, b_col)


# ------------------------------------------------------------------------------ reference

def _conv1d_k3_ref(x, w_oik, b):
    y = lax.conv_general_dilated(
        x, w_oik, window_strides=(1,), padding=((1, 1),),
        dimension_numbers=("NCH", "OIH", "NCH"),
        precision=lax.Precision.HIGHEST)
    return y + b.reshape(1, -1, 1)


def _check(name, x, w2, b2, **kwargs):
    out = jax.block_until_ready(residual_block(x, w2, b2, **kwargs))
    N, C, L = x.shape
    assert out.shape == (N, C, L) and out.dtype == jnp.float32

    # (A) tight check: f32 reference fed the *same* bf16-rounded operands the kernel uses
    #     (bf16 products are exact in f32, so only summation order differs).
    w_cat, _ = fold_conv2_params(w2, b2)
    wq = w_cat.astype(jnp.float32)
    w_fold = jnp.stack([wq[:, :C], wq[:, C:2 * C], wq[:, 2 * C:]], axis=-1)   # (C, C, 3)
    xq = x.astype(jnp.bfloat16).astype(jnp.float32)
    ref_exact = _conv1d_k3_ref(xq, w_fold, b2)
    assert jnp.allclose(out, ref_exact, atol=1e-4, rtol=1e-4), f"{name}: kernel mismatch"

    # (B) loose check against true f32 module semantics: conv2(x) + bias2 + x
    #     (inputs were cast to bf16, hence the looser tolerance).
    ref_f32 = _conv1d_k3_ref(x, w2, b2) + x
    assert jnp.allclose(out, ref_f32, atol=1e-1, rtol=1e-1), f"{name}: semantic mismatch"


if __name__ == "__main__":
    key = jax.random.PRNGKey(0)
    k_small, k_big = jax.random.split(key)

    def make_case(k, N, C, L):
        kx, kw1, kb1, kw2, kb2 = jax.random.split(k, 5)
        x = jax.random.normal(kx, (N, C, L), dtype=jnp.float32)
        bound = 1.0 / jnp.sqrt(3.0 * C)
        # conv1 / bn parameters exist in the module but are dead in forward(); unused here.
        _w1 = jax.random.uniform(kw1, (C, C, 3), jnp.float32, -bound, bound)
        _b1 = jax.random.uniform(kb1, (C,), jnp.float32, -bound, bound)
        w2 = jax.random.uniform(kw2, (C, C, 3), jnp.float32, -bound, bound)
        b2 = jax.random.uniform(kb2, (C,), jnp.float32, -bound, bound)
        return x, w2, b2

    # Small shape consistent with the module (batch=2, channels=4, length=16):
    # exercises the single-tile fallback path.
    x_s, w2_s, b2_s = make_case(k_small, 2, 4, 16)
    _check("single-tile", x_s, w2_s, b2_s)

    # Larger shape exercising the lane-dense L-tiled + halo path (grid (2, 4), TL=128).
    x_b, w2_b, b2_b = make_case(k_big, 2, 8, 512)
    _check("l-tiled", x_b, w2_b, b2_b, max_tl=128)

    print("KERNEL_OK")
</pallas_src>

<mosaic_0001>
module attributes {stable_mosaic.version = 11 : i64} {
  func.func @_residual_conv_single_kernel(%arg0: i32, %arg1: memref<1x4x16xbf16, #tpu.memory_space<vmem>>, %arg2: memref<4x12xbf16, #tpu.memory_space<vmem>>, %arg3: memref<4x1xf32, #tpu.memory_space<vmem>>, %arg4: memref<1x4x16xf32, #tpu.memory_space<vmem>>) attributes {dimension_semantics = [#tpu.dimension_semantics<parallel>], iteration_bounds = array<i64: 2>, scalar_prefetch = 0 : i64, scratch_operands = 0 : i64, tpu.core_type = #tpu.core_type<tc>, window_params = [{transform_indices = @transform_0, window_bounds = array<i64: 1, 4, 16>}, {pipeline_mode = #tpu.pipeline_mode<synchronous>, transform_indices = @transform_1, window_bounds = array<i64: 4, 12>}, {pipeline_mode = #tpu.pipeline_mode<synchronous>, transform_indices = @transform_2, window_bounds = array<i64: 4, 1>}, {transform_indices = @transform_3, window_bounds = array<i64: 1, 4, 16>}]} {
    %c0 = arith.constant 0 : index
    %c0_0 = arith.constant 0 : index
    %c0_1 = arith.constant 0 : index
    %0 = vector.load %arg1[%c0, %c0_0, %c0_1] : memref<1x4x16xbf16, #tpu.memory_space<vmem>>, vector<1x4x16xbf16>
    %1 = vector.shape_cast %0 : vector<1x4x16xbf16> to vector<4x16xbf16>
    %cst = arith.constant 0.000000e+00 : bf16
    %2 = vector.broadcast %cst : bf16 to vector<4x1xbf16>
    %3 = vector.extract_strided_slice %1 {offsets = [0, 0], sizes = [4, 15], strides = [1, 1]} : vector<4x16xbf16> to vector<4x15xbf16>
    %4 = tpu.concatenate %2, %3 in 1 : vector<4x1xbf16>, vector<4x15xbf16> -> vector<4x16xbf16>
    %5 = vector.extract_strided_slice %1 {offsets = [0, 1], sizes = [4, 15], strides = [1, 1]} : vector<4x16xbf16> to vector<4x15xbf16>
    %6 = tpu.concatenate %5, %2 in 1 : vector<4x15xbf16>, vector<4x1xbf16> -> vector<4x16xbf16>
    %c0_2 = arith.constant 0 : index
    %c0_3 = arith.constant 0 : index
    %7 = vector.load %arg2[%c0_2, %c0_3] : memref<4x12xbf16, #tpu.memory_space<vmem>>, vector<4x12xbf16>
    %8 = vector.extract_strided_slice %7 {offsets = [0, 0], sizes = [4, 4], strides = [1, 1]} : vector<4x12xbf16> to vector<4x4xbf16>
    %cst_4 = arith.constant dense<0.000000e+00> : vector<4x16xf32>
    %9 = tpu.matmul %8, %4, %cst_4 {dimension_numbers = #tpu.dot_dimension_numbers<[1], [0], [0], [1], [0, 0, 1, 1], [], []>} : vector<4x4xbf16>, vector<4x16xbf16>, vector<4x16xf32> -> vector<4x16xf32>
    %10 = vector.extract_strided_slice %7 {offsets = [0, 4], sizes = [4, 4], strides = [1, 1]} : vector<4x12xbf16> to vector<4x4xbf16>
    %cst_5 = arith.constant dense<0.000000e+00> : vector<4x16xf32>
    %11 = tpu.matmul %10, %1, %cst_5 {dimension_numbers = #tpu.dot_dimension_numbers<[1], [0], [0], [1], [0, 0, 1, 1], [], []>} : vector<4x4xbf16>, vector<4x16xbf16>, vector<4x16xf32> -> vector<4x16xf32>
    %12 = arith.addf %9, %11 : vector<4x16xf32>
    %13 = vector.extract_strided_slice %7 {offsets = [0, 8], sizes = [4, 4], strides = [1, 1]} : vector<4x12xbf16> to vector<4x4xbf16>
    %cst_6 = arith.constant dense<0.000000e+00> : vector<4x16xf32>
    %14 = tpu.matmul %13, %6, %cst_6 {dimension_numbers = #tpu.dot_dimension_numbers<[1], [0], [0], [1], [0, 0, 1, 1], [], []>} : vector<4x4xbf16>, vector<4x16xbf16>, vector<4x16xf32> -> vector<4x16xf32>
    %15 = arith.addf %12, %14 : vector<4x16xf32>
    %c0_7 = arith.constant 0 : index
    %c0_8 = arith.constant 0 : index
    %16 = vector.load %arg3[%c0_7, %c0_8] : memref<4x1xf32, #tpu.memory_space<vmem>>, vector<4x1xf32>
    %17 = vector.broadcast %16 : vector<4x1xf32> to vector<4x16xf32>
    %18 = arith.addf %15, %17 : vector<4x16xf32>
    %c0_9 = arith.constant 0 : index
    %c0_10 = arith.constant 0 : index
    %c0_11 = arith.constant 0 : index
    %19 = vector.load %arg4[%c0_9, %c0_10, %c0_11] : memref<1x4x16xf32, #tpu.memory_space<vmem>>, vector<1x4x16xf32>
    %20 = vector.shape_cast %19 : vector<1x4x16xf32> to vector<4x16xf32>
    %21 = vector.shape_cast %18 : vector<4x16xf32> to vector<1x4x16xf32>
    tpu.vector_store %arg4[%c0_9, %c0_10, %c0_11], %21 {strides = array<i32>} : memref<1x4x16xf32, #tpu.memory_space<vmem>>, vector<1x4x16xf32>,
    return
  }
  func.func @transform_0(%arg0: i32) -> (i32, i32, i32) {
    %c0_i32 = arith.constant 0 : i32
    %c0_i32_0 = arith.constant 0 : i32
    %c0_i32_1 = arith.constant 0 : i32
    return %arg0, %c0_i32, %c0_i32_0 : i32, i32, i32
  }
  func.func @transform_1(%arg0: i32) -> (i32, i32) {
    %c0_i32 = arith.constant 0 : i32
    %c0_i32_0 = arith.constant 0 : i32
    %c0_i32_1 = arith.constant 0 : i32
    return %c0_i32, %c0_i32_0 : i32, i32
  }
  func.func @transform_2(%arg0: i32) -> (i32, i32) {
    %c0_i32 = arith.constant 0 : i32
    %c0_i32_0 = arith.constant 0 : i32
    %c0_i32_1 = arith.constant 0 : i32
    return %c0_i32, %c0_i32_0 : i32, i32
  }
  func.func @transform_3(%arg0: i32) -> (i32, i32, i32) {
    %c0_i32 = arith.constant 0 : i32
    %c0_i32_0 = arith.constant 0 : i32
    %c0_i32_1 = arith.constant 0 : i32
    return %arg0, %c0_i32, %c0_i32_0 : i32, i32, i32
  }
}

</mosaic_0001>

<bundles_post_ra>
// kernel: tpu_custom_call.1
= control target key start
LH: loop header
LB: loop body
LE: loop exit
PB: predicated region body
PF: predicated region fallthrough
CT: control target
= control target key end

     0   :  { %8 = vsyncpa [#allocation3], 0  ;;  %s714_s0 = inlined_call_operand.vmem [shape: bf16[2,4,16], index: 0, kind: input, shape index: {}]   ;;  %s715_s1 = inlined_call_operand.vmem [shape: bf16[4,12], index: 1, kind: input, shape index: {}]   ;;  %s716_s2 = inlined_call_operand.vmem [shape: f32[4,1], index: 2, kind: input, shape index: {}]   ;;  %s717_s3 = inlined_call_operand.hbm [shape: f32[2,4,16], index: 3, kind: output, shape index: {}]  }
   0x1   :  { %10 = vsyncpa [#allocation3 + $0x1], 0  ;;  %s599_s12 = smov 0   ;;  %s601_s13 = smov 0  }
   0x2   :  { %s603_s14 = smov 0   ;;  %s605_s15 = smov 0  }
   0x3 LB: > { %s620_s16 = sadd.s32 4294967295, %s568_s15   ;;  %s421_s17 = sadd.s32 4294967294, %s568_s15   ;;  %s568_s15 = sphi %s605_s15, %s723_s15   ;;  %s564_s14 = sphi %s603_s14, %s722_s14   ;;  %s560_s13 = sphi %s601_s13, %s721_s13   ;;  %s556_s12 = sphi %s599_s12, %s720_s12  }
   0x4   : > { %s624_s18 = sadd.s32 1, %s568_s15   ;;  %s91_s19 = sadd.s32 1, %s564_s14 }
   0x5   : > { %s88_s20 = ssub.s32 %s568_s15, %s624_s18  ;;  %p101_p0 = scmp.ne.s32.totalorder %s564_s14, %s560_s13 }
   0x6   : > { %p89_p1 = scmp.eq.s32.totalorder %s88_s20, 0  ;;  %p102_p2 = scmp.eq.s32.totalorder %s620_s16, 1 }
   0x7   : > { %p107_p3 = scmp.ne.s32.totalorder %s560_s13, %s556_s12  ;;  %p108_p4 = scmp.eq.s32.totalorder %s421_s17, 1 }
   0x8   : > { %s635_s21 = scalar_select %p89_p1, %s564_s14, %s91_s19  }
   0x9   : > { %p637_p5 = por %p102_p2, %p101_p0  ;;  %p641_p6 = por %p108_p4, %p107_p3 }
   0xa   : > { %p424_p7 = scmp.ge.s32.totalorder %s568_s15, 1  ;;  %p139_p8 = scmp.lt.s32.totalorder %s568_s15, 3 }
   0xc   : > { %p140_p9 = pnand %p424_p7, %p139_p8 }
   0xd   : > { %v172_v0 = vlaneseq (!%p140_p9)  ;;  %p162_p10 = scmp.lt.s32.totalorder (!%p140_p9), %s620_s16, 1  ;;  %v570_v1 = vmov (!%p140_p9), 1983009808   ;;  %v571_v4 = vmov (!%p140_p9), 0.0   ;;  %vm572_vm0 = vmmov (!%p140_p9), 0   ;;  %s574_s4 = smov (!%p140_p9), 124  }
   0xe   : > { %143 = sbr.rel (%p140_p9) target bundleno = 381 (0x17d), region = 32  ;;  %v170_v2 = vunpack.c.l.s4 (!%p140_p9), %v570_v1  ;;  %440 = vmatprep.subr.bf16.mxu0 (!%p140_p9), %v571_v4  ;;  %442 = vmatprep.mubr.msk.bf16.mxu0 (!%p140_p9), %vm572_vm0, %v571_v4  ;;  %v187_v6 = vld [vmem:[%s715_s1] sm:$0x3] (!%p140_p9)  ;;  %vm202_vm1 = vcmask (!%p140_p9), 1041408   ;;  %v573_v9 = vmov (!%p140_p9), 0   ;;  %s575_s5 = smov (!%p140_p9), 127  }
   0xf   : > { %v173_v3 = vshrl.u32 (!%p140_p9), %v172_v0, 7  ;;  %446 = vmatprep.subr.bf16.mxu1 (!%p140_p9), %v571_v4  ;;  %448 = vmatprep.mubr.msk.bf16.mxu1 (!%p140_p9), %vm572_vm0, %v571_v4  ;;  %s576_s6 = smov (!%p140_p9), 1   ;;  %s577_s7 = smov (!%p140_p9), 120   ;;  %v339_v13 = vld [vmem:[%s716_s2] sm:$0xf] (!%p140_p9)  ;;  %vm198_vm2 = vcmask (!%p140_p9), 31744  }
  0x10   : > { %v171_v5 = vunpack.c.0.s8 (!%p140_p9), %v170_v2  ;;  %505 = vset.pattern.permute.xlu0 (!%p140_p9), %v573_v9  ;;  %vm184_vm3 = vcmask (!%p140_p9), 121856   ;;  %vm178_vm4 = vcmask (!%p140_p9), 7168   ;;  %s159_s10 = sand.u32 (!%p140_p9), 1, %s560_s13   ;;  %s431_s17 = sshll.u32 (!%p140_p9), %s620_s16, 6  ;;  %vm346_vm5 = vcmask (!%p140_p9), 125952  }
  0x11   : > { %s425_s11 = sshll.u32 (!%p140_p9), %s159_s10, 2  ;;  %s672_s26 = scalar_lea.hbm (!%p140_p9), %s717_s3, %s431_s17 }
  0x12   : > { %v174_v7 = vsub.s32 (!%p140_p9), %v171_v5, %v173_v3  ;;  %s161_s19 = scalar_lea.vmem (!%p140_p9), [#allocation2], %s425_s11 }
  0x13   : > { %s362_s20 = sshll.u32 (!%p140_p9), %s161_s19, 4  ;;  %s674_s20 = int_to_ptr.vmem [resolvable:$true] %s362_s20 }
  0x14   : > { %v195_v10 = vrot.slane (!%p140_p9), %v187_v6, %v174_v7  ;;  %s506_s28 = scalar_lea.vmem (!%p140_p9), %s674_s20, 64 }
  0x15   : > { %s163_s24 = scalar_select %p162_p10, %s620_s16, 1 }
  0x16   : > { %196 = vrot.lane.b32.xlu0 %v195_v10, %s574_s4  ;;  %p507_p11 = scmp.ne.s32.totalorder %s674_s20, %s506_s28  ;;  %s578_s16 = smov [#allocation2]  }
  0x17   : > { %s426_s27 = sshll.u32 %s163_s24, 1  ;;  %s510_s29 = sshll.u32 %s578_s16, 4  ;;  %s511_s29 = int_to_ptr.vmem [resolvable:$false] %s510_s29 }
  0x18   : > { %s165_s30 = scalar_lea.vmem %s714_s0, %s426_s27  ;;  %s349_s27 = scalar_lea.sflag [#allocation3], %s159_s10 }
  0x19   : > { %v167_v8 = vld [vmem:[%s165_s30] sm:$0x3]  ;;  %p508_p12 = pnand %p507_p11, %p637_p5  ;;  %s512_s30 = scalar_lea.vmem %s511_s29, 128 }
  0x1a   : > { %v175_v11 = vrot.slane %v167_v8, %v174_v7  ;;  %v204_v12 = vsel %vm202_vm1, %v167_v8, 0  ;;  %p513_p0 = scmp.lt.s32.totalorder %s674_s20, %s511_s29  ;;  %p514_p1 = scmp.lt.s32.totalorder %s512_s30, %s506_s28 }
  0x1b   : > { %441 = vmatpush3.bf16.msra.mxu0 %v204_v12  ;;  %p509_p13 = pneg %p508_p12 }
  0x1c   : > { %182 = vrot.lane.b32.xlu1 %v175_v11, %s575_s5  ;;  %452 = vmatprep.subr.bf16.mxu0 %v571_v4  ;;  %p515_p2 = por %p514_p1, %p513_p0 }
  0x1d   : > { %176 = vrot.lane.b32.xlu0 %v175_v11, %s576_s6 }
  0x1e   : > { %p516_p3 = pnand %p515_p2, %p509_p13 }
  0x20   : > { %291 = vrot.lane.b32.xlu1 %v195_v10, %s577_s7 }
  0x21   : > { %342 = vperm.xlu0 %505, %v339_v13  }
  0x88   : > { %v197_v14 = vpop.permute.xlu0 %196 }
  0x89   : > { %443 = vmatmul.mubr.msk.bf16.vlgmr.msra.gmra.mrb[0].mxu0 %vm198_vm2, %v197_v14 }
  0x8a   : > { %454 = vmatprep.mubr.msk.bf16.mxu0 %vm572_vm0, %v571_v4 }
  0x8e   : > { %v183_v15 = vpop.permute.xlu1 %182 }
  0x8f   : > { %v186_v16 = vsel %vm184_vm3, %v183_v15, 0  ;;  %v177_v18 = vpop.permute.xlu0 %176 }
  0x90   : > { %v296_v17 = vsel %vm202_vm1, %v186_v16, 0  ;;  %v181_v19 = vsel %vm178_vm4, 0, %v177_v18 }
  0x91   : > { %453 = vmatpush3.bf16.msra.mxu0 %v296_v17  ;;  %v249_v20 = vsel %vm202_vm1, %v181_v19, 0 }
  0x92   : > { %v292_v21 = vpop.permute.xlu1 %291  ;;  %447 = vmatpush3.bf16.msra.mxu1 %v249_v20 }
  0x94   : > { %455 = vmatmul.mubr.msk.bf16.vlgmr.msra.gmra.mrb[4].mxu0 %vm198_vm2, %v292_v21 }
  0x95   : > { %449 = vmatmul.mubr.msk.bf16.vlgmr.msra.gmra.mrb[0].mxu1 %vm198_vm2, %v187_v6 }
  0xa0   : > { %v343_v27 = vpop.permute.xlu0 %342 }
 0x15c   : > { %v240_v22 = vpop.f32.mrb[0].mxu0 }
 0x15d   : > { %v444_v23 = vpop.f32.mrb[1].mxu0 }
 0x15e   : > { %v243_v24 = vpop.f32.mrb[2].mxu0 }
 0x15f   : > { %v445_v25 = vpop.f32.mrb[3].mxu0 }
 0x167   : > { %v332_v26 = vpop.f32.mrb[4].mxu0 }
 0x168   : > { %v285_v28 = vpop.f32.mrb[0].mxu1  ;;  %v456_v29 = vpop.f32.mrb[5].mxu0 }
 0x169   : > { %v286_v30 = vadd.f32 %v285_v28, %v240_v22  ;;  %v450_v31 = vpop.f32.mrb[1].mxu1  ;;  %v335_v32 = vpop.f32.mrb[6].mxu0 }
 0x16a   : > { %v288_v33 = vpop.f32.mrb[2].mxu1  ;;  %v457_v34 = vpop.f32.mrb[7].mxu0 }
 0x16b   : > { %v451_v35 = vpop.f32.mrb[3].mxu1  ;;  %v338_v36 = vadd.f32 %v332_v26, %v286_v30 }
 0x16d   : > { %v345_v37 = vadd.f32 %v343_v27, %v338_v36 }
 0x16f   : > { %347 = vst.msk [vmem:[%s161_s19] sm:$0xf] %vm346_vm5, %v345_v37 }
 0x170   : > { %519 = shalt.err (!%p516_p3)
}
 0x171   : > { %s520_s4 = scalar_lea.hbm %s672_s26, 64  ;;  %s524_s7 = scalar_lea.hbm %s717_s3, 128 }
 0x172   : > { %p521_p4 = scmp.ne.s32.totalorder %s672_s26, %s520_s4  ;;  %p525_p9 = scmp.lt.u32.totalorder %s672_s26, %s717_s3 }
 0x173   : > { %p526_p10 = scmp.lt.u32.totalorder %s524_s7, %s520_s4  ;;  %p528_p12 = scmp.lt.u32.totalorder %s520_s4, %s672_s26 }
 0x174   : > { %p522_p7 = pnand %p521_p4, %p637_p5 }
 0x175   : > { %p527_p11 = por %p526_p10, %p525_p9 }
 0x176   : > { %p523_p8 = pneg %p522_p7 }
 0x177   : > { %p529_p13 = por %p528_p12, %p527_p11 }
 0x179   : > { %p530_p0 = pnand %p529_p13, %p523_p8 }
 0x17b   : > { %533 = shalt.err (!%p530_p0)
}
 0x17c   : > { %458 = dma.vmem_to_hbm [thread:$0]  (%p637_p5), %s674_s20, 64, %s672_s26, %s349_s27  }
 0x17d PF: > { %p464_p1 = scmp.ge.s32.totalorder %s568_s15, 2  ;;  %s374_s10 = sand.u32 1, %s556_s12  }
 0x17e   : > { %s375_s11 = scalar_lea.sflag [#allocation3], %s374_s10 }
 0x17f   : > { %p461_p2 = pnand %p464_p1, %p641_p6 }
 0x181   : > { %551 = dma.done.wait (!%p461_p2), %s375_s11, 64  }
 0x182   : > { %553 = vsyncadd (!%p461_p2), %s375_s11, 4294967232  ;;  %p13_p3 = scmp.ge.s32.totalorder %s624_s18, 4   ;;  %s720_s12 = smov %s560_s13 }
 0x183   : > { %s721_s13 = smov %s564_s14  ;;  %s722_s14 = smov %s635_s21 }
 0x184   : > { %s723_s15 = smov %s624_s18  ;;  %15 = sbr.rel (!%p13_p3) target bundleno = 3 (0x3), region = 67 }
 0x18b   :  { %380 = vsyncpa [#allocation3], 1 }
 0x18c   :  { %382 = vsyncpa [#allocation3 + $0x1], 1 }

</bundles_post_ra>
